<compile_context>
chip_gen: v7x
topology: tpu7x:2x2x1
jax: 0.10.0
libtpu: 0.0.40
codegen_flags: <defaults>
</compile_context>

<pallas_src>
import functools
import math

import numpy as np
import jax
import jax.numpy as jnp
from jax import lax
from jax.experimental import pallas as pl
from jax.experimental.pallas import tpu as pltpu


# --------------------------------------------------------------------------- #
# helpers
# --------------------------------------------------------------------------- #
def _round_up(x, m):
    return (x + m - 1) // m * m


def _divisors(n):
    return sorted(d for d in range(1, n + 1) if n % d == 0)


def _sublane_mult(itemsize):
    # native sublane tile: 8 for 4-byte, 16 for 2-byte, 32 for 1-byte dtypes
    return max(8, 32 // max(1, itemsize))


def _padded_block_bytes(lead, sub, lane, itemsize):
    """VMEM footprint of one (lead, sub, lane) block with (sublane, lane) padding."""
    return (lead * _round_up(sub, _sublane_mult(itemsize))
            * _round_up(lane, 128) * itemsize)


def _vmem_budget():
    """(total working-set budget, vmem_limit_bytes, per-input-block target) per gen."""
    try:
        kind = jax.devices()[0].device_kind.lower()
    except Exception:
        kind = ""
    if "v7" in kind:
        # v7x: 64 MiB VMEM per TensorCore -> stay tight (32 MiB scoped limit).
        return 24 * 2**20, 32 * 2**20, 3 * 2**20
    # v5e / v6e: 128 MiB physical VMEM -> bigger blocks amortize per-step overhead.
    return 72 * 2**20, 96 * 2**20, 8 * 2**20


# --------------------------------------------------------------------------- #
# kernel
# --------------------------------------------------------------------------- #
def _avgpool_shortcut_kernel(x_ref, pw_ref, o_ref, *, n_real):
    j = pl.program_id(2)  # output-channel block index (innermost grid axis)

    @pl.when(j < n_real)
    def _compute():
        lhs = x_ref[...]                       # (b_n, c_blk, K) -- flat spatial on lanes
        if lhs.dtype != pw_ref.dtype:          # compile-time branch
            lhs = lhs.astype(pw_ref.dtype)
        # One contraction does H-pool + W-pool + (h,w)->flat merge.  Accumulation
        # is in the MXU f32 accumulator regardless of operand dtype.
        y = lax.dot_general(lhs, pw_ref[...], (((2,), (0,)), ((), ())),
                            preferred_element_type=jnp.float32)
        o_ref[...] = y.astype(o_ref.dtype)     # lane-dense store (>=128 lanes typical)

    @pl.when(j >= n_real)
    def _pad():
        # Zero-padding channel block: single lane-dense store, no input read.
        o_ref[...] = jnp.zeros(o_ref.shape, o_ref.dtype)


# --------------------------------------------------------------------------- #
# wrapper
# --------------------------------------------------------------------------- #
@functools.partial(jax.jit, static_argnames=("stride", "out_c", "in_c"))
def avg_pool_shortcut(x, *, stride, out_c, in_c):
    """Pallas implementation of AvgPoolShortCut.forward. x: (N, in_c, H, W)."""
    N, C, H, W = x.shape
    assert C == in_c and out_c >= in_c

    s = stride
    k = 1 if (H % 2 != 0) else stride          # PyTorch: kernel=1 if H odd else stride
    h_out = (H - k) // s + 1
    w_out = (W - k) // s + 1
    hw_out = h_out * w_out

    itemsize = jnp.dtype(x.dtype).itemsize
    mat_dtype = jnp.bfloat16 if x.dtype == jnp.bfloat16 else jnp.float32
    mat_itemsize = jnp.dtype(mat_dtype).itemsize
    budget, vmem_limit, block_target = _vmem_budget()

    # ---- spatial tiling along the flattened (h*w) lane dim ----------------- #
    # A spatial tile of t_rows output rows needs t_rows*s contiguous input rows
    # (k == s in the even path).  Non-full blocks must keep the lane dim a
    # multiple of 128.  The odd-H path uses a single full block (no overrun).
    if k == 1:
        t_rows = h_out
    else:
        cands = [t for t in _divisors(h_out)
                 if t == h_out or (t * w_out % 128 == 0 and t * s * W % 128 == 0)]
        dense = [t for t in cands if 128 <= t * w_out <= 384]   # lane-dense, MXU-cheap
        t_rows = max(dense) if dense else h_out
    n_sp = h_out // t_rows
    rows_in = H if n_sp == 1 else t_rows * s
    L_in = rows_in * W          # input  block lane extent (flat spatial)
    L_out = t_rows * w_out      # output block lane extent (flat spatial)

    # ---- channel blocking --------------------------------------------------- #
    g = math.gcd(in_c, out_c)
    c_cands = [d for d in _divisors(g)
               if d % _sublane_mult(itemsize) == 0 or (d == in_c and d == out_c)]
    pw_bytes = 2 * _padded_block_bytes(1, L_in, L_out, mat_itemsize)

    def _total_bytes(b_n_, c_blk_):
        return (2 * _padded_block_bytes(b_n_, c_blk_, L_in, itemsize)
                + 2 * _padded_block_bytes(b_n_, c_blk_, L_out, itemsize)
                + pw_bytes)

    in_kernel_pad = bool(c_cands)
    if in_kernel_pad:
        fitting = [d for d in c_cands if _total_bytes(1, d) <= budget]
        c_blk = max(fitting) if fitting else min(c_cands)
        pallas_out_c = out_c
        n_real = in_c // c_blk
        n_blocks = out_c // c_blk
    else:
        # Tiny / unaligned channel counts: single full-channel block, pad in wrapper.
        c_blk = in_c
        pallas_out_c = in_c
        n_real = 1
        n_blocks = 1

    # ---- batch blocking: grow blocks to amortize the per-grid-step overhead -- #
    b_n = 1
    for cand in _divisors(N):
        if (_padded_block_bytes(cand, c_blk, L_in, itemsize) <= block_target
                and _total_bytes(cand, c_blk) <= budget):
            b_n = cand

    grid = (N // b_n, n_sp, n_blocks)

    # ---- constant pooling/selection matrix (built on host, resident in VMEM) -- #
    K, F = L_in, L_out
    ki = np.arange(K)
    r, w = ki // W, ki % W
    fo = np.arange(F)
    t, wo = fo // w_out, fo % w_out
    sel = ((r[:, None] >= t[None, :] * s) & (r[:, None] < t[None, :] * s + k)
           & (w[:, None] >= wo[None, :] * s) & (w[:, None] < wo[None, :] * s + k))
    pw = jnp.asarray(np.where(sel, 1.0 / float(k * k), 0.0), dtype=mat_dtype)

    x_flat = x.reshape(N, C, H * W)            # free view (contiguous dims)

    kernel = functools.partial(_avgpool_shortcut_kernel, n_real=n_real)

    out_flat = pl.pallas_call(
        kernel,
        out_shape=jax.ShapeDtypeStruct((N, pallas_out_c, hw_out), x.dtype),
        grid=grid,
        in_specs=[
            # Pad channel blocks clamp to the last real block; channel axis is the
            # innermost grid dim so the clamped index repeats consecutively and no
            # new input DMA is issued for pad steps.
            pl.BlockSpec((b_n, c_blk, L_in),
                         lambda n, hh, j: (n, jnp.minimum(j, n_real - 1), hh)),
            # Selection matrix: constant index -> DMA'd once, stays resident.
            pl.BlockSpec((K, F), lambda n, hh, j: (0, 0)),
        ],
        out_specs=pl.BlockSpec((b_n, c_blk, L_out), lambda n, hh, j: (n, j, hh)),
        compiler_params=pltpu.CompilerParams(
            # channel axis "arbitrary": megacore splits batch/spatial -> balanced
            # real work on both v7x TensorCores (pad blocks not concentrated).
            dimension_semantics=("parallel", "parallel", "arbitrary"),
            vmem_limit_bytes=vmem_limit,
        ),
        # (pipeline_mode=pl.Buffered(3) on the input is a possible further sweep.)
    )(x_flat, pw)

    out = out_flat.reshape(N, pallas_out_c, h_out, w_out)   # free view
    if not in_kernel_pad and out_c > in_c:
        pad = jnp.zeros((N, out_c - in_c, h_out, w_out), x.dtype)
        out = jnp.concatenate((out, pad), axis=1)
    return out


# --------------------------------------------------------------------------- #
# pure-JAX reference (mirrors the PyTorch forward) + self-test
# --------------------------------------------------------------------------- #
def _reference(x, *, stride, out_c, in_c):
    N, C, H, W = x.shape
    if H % 2 != 0:
        y = x[:, :, ::stride, ::stride]
    else:
        h_out, w_out = H // stride, W // stride
        y = x[:, :, : h_out * stride, : w_out * stride]
        y = y.reshape(N, C, h_out, stride, w_out, stride).mean(axis=(3, 5))
    pad = jnp.zeros((N, out_c - in_c, y.shape[2], y.shape[3]), y.dtype)
    return jnp.concatenate((y, pad), axis=1)


if __name__ == "__main__":
    k_even, k_odd = jax.random.split(jax.random.PRNGKey(0))

    # Even-H path: avg_pool2d(kernel=stride, stride=stride) + channel zero-pad.
    x = jax.random.normal(k_even, (2, 4, 16, 16), dtype=jnp.float32)
    out = jax.block_until_ready(avg_pool_shortcut(x, stride=2, out_c=8, in_c=4))
    ref = _reference(x, stride=2, out_c=8, in_c=4)
    assert out.shape == ref.shape, (out.shape, ref.shape)
    assert jnp.allclose(out, ref, atol=1e-5, rtol=1e-5), "even-H mismatch vs reference"

    # Odd-H path: avg_pool2d(kernel=1, stride=stride) (pure subsampling).
    x2 = jax.random.normal(k_odd, (2, 4, 7, 7), dtype=jnp.float32)
    out2 = jax.block_until_ready(avg_pool_shortcut(x2, stride=2, out_c=8, in_c=4))
    ref2 = _reference(x2, stride=2, out_c=8, in_c=4)
    assert out2.shape == ref2.shape, (out2.shape, ref2.shape)
    assert jnp.allclose(out2, ref2, atol=1e-5, rtol=1e-5), "odd-H mismatch vs reference"

    # ResNet-like shape exercising the in-kernel channel-pad path (Regime A).
    x3 = jax.random.normal(jax.random.PRNGKey(1), (2, 64, 32, 32), dtype=jnp.float32)
    out3 = jax.block_until_ready(avg_pool_shortcut(x3, stride=2, out_c=128, in_c=64))
    ref3 = _reference(x3, stride=2, out_c=128, in_c=64)
    assert out3.shape == ref3.shape, (out3.shape, ref3.shape)
    assert jnp.allclose(out3, ref3, atol=1e-5, rtol=1e-5), "ResNet-shape mismatch"

    print("KERNEL_OK")
</pallas_src>

<mosaic_0001>
module attributes {stable_mosaic.version = 11 : i64} {
  func.func @_avgpool_shortcut_kernel(%arg0: i32, %arg1: i32, %arg2: i32, %arg3: memref<2x4x256xf32, #tpu.memory_space<vmem>>, %arg4: memref<256x64xf32, #tpu.memory_space<vmem>>, %arg5: memref<2x4x64xf32, #tpu.memory_space<vmem>>) attributes {dimension_semantics = [#tpu.dimension_semantics<parallel>, #tpu.dimension_semantics<parallel>, #tpu.dimension_semantics<arbitrary>], iteration_bounds = array<i64: 1, 1, 1>, scalar_prefetch = 0 : i64, scratch_operands = 0 : i64, tpu.core_type = #tpu.core_type<tc>, window_params = [{transform_indices = @transform_0, window_bounds = array<i64: 2, 4, 256>}, {pipeline_mode = #tpu.pipeline_mode<synchronous>, transform_indices = @transform_1, window_bounds = array<i64: 256, 64>}, {transform_indices = @transform_2, window_bounds = array<i64: 2, 4, 64>}]} {
    %c1_i32 = arith.constant 1 : i32
    %0 = arith.cmpi slt, %arg2, %c1_i32 : i32
    %1 = arith.extui %0 : i1 to i32
    %c0_i32 = arith.constant 0 : i32
    %2 = arith.cmpi ne, %1, %c0_i32 : i32
    scf.if %2 {
      %c0 = arith.constant 0 : index
      %c0_2 = arith.constant 0 : index
      %c0_3 = arith.constant 0 : index
      %6 = vector.load %arg3[%c0, %c0_2, %c0_3] : memref<2x4x256xf32, #tpu.memory_space<vmem>>, vector<2x4x256xf32>
      %c0_4 = arith.constant 0 : index
      %c0_5 = arith.constant 0 : index
      %7 = vector.load %arg4[%c0_4, %c0_5] : memref<256x64xf32, #tpu.memory_space<vmem>>, vector<256x64xf32>
      %cst = arith.constant dense<0.000000e+00> : vector<2x4x64xf32>
      %8 = tpu.matmul %6, %7, %cst {dimension_numbers = #tpu.dot_dimension_numbers<[2], [0], [0, 1], [1], [0, 0, 0, 1, 1, 1], [], []>} : vector<2x4x256xf32>, vector<256x64xf32>, vector<2x4x64xf32> -> vector<2x4x64xf32>
      %c0_6 = arith.constant 0 : index
      %c0_7 = arith.constant 0 : index
      %c0_8 = arith.constant 0 : index
      %9 = vector.load %arg5[%c0_6, %c0_7, %c0_8] : memref<2x4x64xf32, #tpu.memory_space<vmem>>, vector<2x4x64xf32>
      tpu.vector_store %arg5[%c0_6, %c0_7, %c0_8], %8 {strides = array<i32>} : memref<2x4x64xf32, #tpu.memory_space<vmem>>, vector<2x4x64xf32>,
    } else {
    }
    %c1_i32_0 = arith.constant 1 : i32
    %3 = arith.cmpi sge, %arg2, %c1_i32_0 : i32
    %4 = arith.extui %3 : i1 to i32
    %c0_i32_1 = arith.constant 0 : i32
    %5 = arith.cmpi ne, %4, %c0_i32_1 : i32
    scf.if %5 {
      %cst = arith.constant 0.000000e+00 : f32
      %6 = vector.broadcast %cst : f32 to vector<2x4x64xf32>
      %c0 = arith.constant 0 : index
      %c0_2 = arith.constant 0 : index
      %c0_3 = arith.constant 0 : index
      %7 = vector.load %arg5[%c0, %c0_2, %c0_3] : memref<2x4x64xf32, #tpu.memory_space<vmem>>, vector<2x4x64xf32>
      tpu.vector_store %arg5[%c0, %c0_2, %c0_3], %6 {strides = array<i32>} : memref<2x4x64xf32, #tpu.memory_space<vmem>>, vector<2x4x64xf32>,
    } else {
    }
    return
  }
  func.func @transform_0(%arg0: i32, %arg1: i32, %arg2: i32) -> (i32, i32, i32) {
    %c0_i32 = arith.constant 0 : i32
    %0 = arith.minsi %arg2, %c0_i32 : i32
    %c0_i32_0 = arith.constant 0 : i32
    return %arg0, %0, %arg1 : i32, i32, i32
  }
  func.func @transform_1(%arg0: i32, %arg1: i32, %arg2: i32) -> (i32, i32) {
    %c0_i32 = arith.constant 0 : i32
    %c0_i32_0 = arith.constant 0 : i32
    %c0_i32_1 = arith.constant 0 : i32
    return %c0_i32, %c0_i32_0 : i32, i32
  }
  func.func @transform_2(%arg0: i32, %arg1: i32, %arg2: i32) -> (i32, i32, i32) {
    %c0_i32 = arith.constant 0 : i32
    return %arg0, %arg2, %arg1 : i32, i32, i32
  }
}

</mosaic_0001>

<bundles_post_ra>
// kernel: avg_pool_shortcut.1
= control target key start
LH: loop header
LB: loop body
LE: loop exit
PB: predicated region body
PF: predicated region fallthrough
CT: control target
= control target key end

     0   :  { %7 = vsyncpa [#allocation3], 0  ;;  %s392_s0 = inlined_call_operand.hbm [shape: f32[2,4,256], index: 0, kind: input, shape index: {}]   ;;  %s393_s1 = inlined_call_operand.hbm [shape: f32[256,64], index: 1, kind: input, shape index: {}]   ;;  %s394_s2 = inlined_call_operand.hbm [shape: f32[2,4,64], index: 2, kind: output, shape index: {}]  }
   0x1   :  { %8 = vsyncpa [#allocation6], 0 }
   0x2   :  { %9 = vsyncpa [#allocation4], 0  ;;  %s334_s9 = smov [#allocation2]   ;;  %s262_s13 = scalar_lea.hbm %s392_s0, 256 }
   0x3   :  { %s15_s10 = sshll.u32 %s334_s9, 4  ;;  %p263_p0 = scmp.ne.s32.totalorder %s392_s0, %s262_s13  ;;  %s16_s10 = int_to_ptr.vmem [resolvable:$true] %s15_s10 }
   0x4   :  { %p266_p1 = scmp.lt.u32.totalorder %s262_s13, %s392_s0 }
   0x6   :  { %p268_p2 = pnand %p266_p1, %p263_p0 }
   0x8   :  { %271 = shalt.err (!%p268_p2)
}
   0x9   :  { %s272_s18 = scalar_lea.vmem %s16_s10, 256  ;;  %p277_p4 = scmp.lt.s32.totalorder %s16_s10, %s16_s10 }
   0xa   :  { %p273_p3 = scmp.ne.s32.totalorder %s16_s10, %s272_s18  ;;  %p278_p5 = scmp.lt.s32.totalorder %s272_s18, %s272_s18 }
   0xc   :  { %p279_p6 = por %p278_p5, %p277_p4 }
   0xe   :  { %p280_p7 = pnand %p279_p6, %p273_p3 }
  0x10   :  { %283 = shalt.err (!%p280_p7)
}
  0x11   :  { %s335_s19 = smov 128   ;;  %s336_s20 = smov 8  }
  0x12   :  { %21 = dma.hbm_to_vmem [thread:$0]  %s392_s0, 256, %s16_s10, [#allocation3], %s335_s19, %s335_s19, %s336_s20  }
  0x13   :  { %s337_s23 = smov [#allocation5]   ;;  %s284_s27 = scalar_lea.hbm %s393_s1, 4096 }
  0x14   :  { %s27_s24 = sshll.u32 %s337_s23, 4  ;;  %p285_p8 = scmp.ne.s32.totalorder %s393_s1, %s284_s27  ;;  %s28_s24 = int_to_ptr.vmem [resolvable:$true] %s27_s24 }
  0x15   :  { %p288_p9 = scmp.lt.u32.totalorder %s284_s27, %s393_s1 }
  0x17   :  { %p290_p10 = pnand %p288_p9, %p285_p8 }
  0x19   :  { %293 = shalt.err (!%p290_p10)
}
  0x1a   :  { %s294_s4 = scalar_lea.vmem %s28_s24, 4096  ;;  %p299_p12 = scmp.lt.s32.totalorder %s28_s24, %s28_s24 }
  0x1b   :  { %p295_p11 = scmp.ne.s32.totalorder %s28_s24, %s294_s4  ;;  %p300_p13 = scmp.lt.s32.totalorder %s294_s4, %s294_s4 }
  0x1d   :  { %p301_p0 = por %p300_p13, %p299_p12 }
  0x1f   :  { %p302_p1 = pnand %p301_p0, %p295_p11 }
  0x21   :  { %305 = shalt.err (!%p302_p1)
}
  0x22   :  { %33 = dma.hbm_to_vmem [thread:$0]  %s393_s1, 4096, %s28_s24, [#allocation6], %s335_s19, %s335_s19, %s336_s20  }
  0x23   :  { %328 = dma.done.wait [#allocation3], 256  }
  0x24   :  { %329 = vsyncadd [#allocation3], 4294967040 }
  0x25   :  { %330 = dma.done.wait [#allocation6], 4096  }
  0x26   :  { %331 = vsyncadd [#allocation6], 4294963200  ;;  %v62_v0 = vld [vmem:[#allocation5 + $0x80] sm:$0xff]  ;;  %v63_v1 = vld [vmem:[#allocation5 + $0x88] sm:$0xff]  ;;  %s338_s1 = smov [#allocation7]   ;;  %vm157_vm0 = vcmask 519168  }
  0x27   :  { %v46_v2 = vld [vmem:[#allocation5] sm:$0xff]  ;;  %v220_v3 = vpack.c.bf16 %v63_v1, %v62_v0  ;;  %v47_v4 = vld [vmem:[#allocation5 + $0x8] sm:$0xff]  ;;  %v64_v5 = vld [vmem:[#allocation5 + $0x90] sm:$0xff]  ;;  %s172_s6 = sshll.u32 %s338_s1, 4  ;;  %s173_s6 = int_to_ptr.vmem [resolvable:$true] %s172_s6 }
  0x28   :  { %v65_v6 = vld [vmem:[#allocation5 + $0x98] sm:$0xff]  ;;  %v222_v7 = vpack.c.bf16 %v47_v4, %v46_v2  ;;  %v48_v9 = vld [vmem:[#allocation5 + $0x10] sm:$0xff]  ;;  %v66_v11 = vld [vmem:[#allocation5 + $0xa0] sm:$0xff]  ;;  %s306_s7 = scalar_lea.vmem %s173_s6, 128  ;;  %p311_p3 = scmp.lt.s32.totalorder %s173_s6, %s173_s6 }
  0x29   :  { %v224_v8 = vpack.c.bf16 %v65_v6, %v64_v5  ;;  %v49_v10 = vld [vmem:[#allocation5 + $0x18] sm:$0xff]  ;;  %221 = vmatprep.subr.bf16.mxu0 %v220_v3  ;;  %v67_v12 = vld [vmem:[#allocation5 + $0xa8] sm:$0xff]  ;;  %v50_v15 = vld [vmem:[#allocation5 + $0x20] sm:$0xff]  ;;  %p307_p2 = scmp.ne.s32.totalorder %s173_s6, %s306_s7  ;;  %p312_p4 = scmp.lt.s32.totalorder %s306_s7, %s306_s7 }
  0x2a   :  { %223 = vmatpush3.bf16.msra.mxu0 %v222_v7  ;;  %v226_v13 = vpack.c.bf16 %v49_v10, %v48_v9  ;;  %v228_v14 = vpack.c.bf16 %v67_v12, %v66_v11  ;;  %v51_v16 = vld [vmem:[#allocation5 + $0x28] sm:$0xff]  ;;  %v68_v17 = vld [vmem:[#allocation5 + $0xb0] sm:$0xff]  ;;  %v69_v18 = vld [vmem:[#allocation5 + $0xb8] sm:$0xff] }
  0x2b   :  { %225 = vmatprep.subr.bf16.mxu0 %v224_v8  ;;  %v230_v19 = vpack.c.bf16 %v51_v16, %v50_v15  ;;  %v232_v20 = vpack.c.bf16 %v69_v18, %v68_v17  ;;  %v52_v21 = vld [vmem:[#allocation5 + $0x30] sm:$0xff]  ;;  %v53_v22 = vld [vmem:[#allocation5 + $0x38] sm:$0xff]  ;;  %v70_v23 = vld [vmem:[#allocation5 + $0xc0] sm:$0xff]  ;;  %p313_p5 = por %p312_p4, %p311_p3 }
  0x2c   :  { %v71_v24 = vld [vmem:[#allocation5 + $0xc8] sm:$0xff]  ;;  %v261_v25 = vld [vmem:[#allocation2 + $0x4] ss:$8 sps:$4 sm:$0xff]   ;;  %v234_v26 = vpack.c.bf16 %v53_v22, %v52_v21  ;;  %v54_v28 = vld [vmem:[#allocation5 + $0x40] sm:$0xff] }
  0x2d   :  { %v236_v27 = vpack.c.bf16 %v71_v24, %v70_v23  ;;  %v55_v29 = vld [vmem:[#allocation5 + $0x48] sm:$0xff]  ;;  %148 = vmatprep.mubr.f32.mxu0 %v261_v25  ;;  %v72_v30 = vld [vmem:[#allocation5 + $0xd0] sm:$0xff]  ;;  %v73_v31 = vld [vmem:[#allocation5 + $0xd8] sm:$0xff]  ;;  %p314_p6 = pnand %p313_p5, %p307_p2 }
  0x2e   :  { %227 = vmatpush3.bf16.msra.mxu0 %v226_v13  ;;  %v238_v32 = vpack.c.bf16 %v55_v29, %v54_v28  ;;  %v240_v33 = vpack.c.bf16 %v73_v31, %v72_v30  ;;  %v56_v34 = vld [vmem:[#allocation5 + $0x50] sm:$0xff]  ;;  %v57_v35 = vld [vmem:[#allocation5 + $0x58] sm:$0xff]  ;;  %v74_v36 = vld [vmem:[#allocation5 + $0xe0] sm:$0xff] }
  0x2f   :  { %229 = vmatprep.subr.bf16.mxu0 %v228_v14  ;;  %v75_v37 = vld [vmem:[#allocation5 + $0xe8] sm:$0xff]  ;;  %v242_v38 = vpack.c.bf16 %v57_v35, %v56_v34  ;;  %v58_v40 = vld [vmem:[#allocation5 + $0x60] sm:$0xff]  ;;  %v76_v42 = vld [vmem:[#allocation5 + $0xf0] sm:$0xff] }
  0x30   :  { %v244_v39 = vpack.c.bf16 %v75_v37, %v74_v36  ;;  %v59_v41 = vld [vmem:[#allocation5 + $0x68] sm:$0xff]  ;;  %v77_v43 = vld [vmem:[#allocation5 + $0xf8] sm:$0xff]  ;;  %v60_v46 = vld [vmem:[#allocation5 + $0x70] sm:$0xff] }
  0x31   :  { %v246_v44 = vpack.c.bf16 %v59_v41, %v58_v40  ;;  %v248_v45 = vpack.c.bf16 %v77_v43, %v76_v42  ;;  %v61_v47 = vld [vmem:[#allocation5 + $0x78] sm:$0xff] }
  0x32   :  { %231 = vmatpush3.bf16.msra.mxu0 %v230_v19  ;;  %v250_v48 = vpack.c.bf16 %v61_v47, %v60_v46  ;;  %v259_v49 = vld [vmem:[#allocation2] ss:$8 sps:$4 sm:$0xff]  }
  0x33   :  { %233 = vmatprep.subr.bf16.mxu0 %v232_v20 }
  0x36   :  { %235 = vmatpush3.bf16.msra.mxu0 %v234_v26 }
  0x37   :  { %237 = vmatprep.subr.bf16.mxu0 %v236_v27 }
  0x3a   :  { %239 = vmatpush3.bf16.msra.mxu0 %v238_v32 }
  0x3b   :  { %241 = vmatprep.subr.bf16.mxu0 %v240_v33 }
  0x3e   :  { %243 = vmatpush3.bf16.msra.mxu0 %v242_v38 }
  0x3f   :  { %245 = vmatprep.subr.bf16.mxu0 %v244_v39 }
  0x42   :  { %247 = vmatpush3.bf16.msra.mxu0 %v246_v44 }
  0x43   :  { %249 = vmatprep.subr.bf16.mxu0 %v248_v45 }
  0x46   :  { %251 = vmatpush3.bf16.msra.mxu0 %v250_v48 }
  0x49   :  { %149 = vmatmul.mubr.f32.vlgmr.msra.gmra.mrb[0].mxu0 %v259_v49 }
 0x11c   :  { %v217_v50 = vpop.f32.mrb[0].mxu0 }
 0x11d   :  { %v218_v51 = vpop.f32.mrb[1].mxu0 }
 0x11e   :  { %v219_v52 = vadd.f32 %v218_v51, %v217_v50 }
 0x120   :  { %v155_v53 = vcombine.high %v219_v52, %v219_v52  ;;  %158 = vst.msk [vmem:[#allocation7] sm:$0xf] %vm157_vm0, %v219_v52 }
 0x122   :  { %159 = vst.msk [vmem:[#allocation7 + $0x4] sm:$0xf] %vm157_vm0, %v155_v53 }
 0x123   :  { %317 = shalt.err (!%p314_p6)
}
 0x124   :  { %s318_s10 = scalar_lea.hbm %s394_s2, 128 }
 0x125   :  { %p319_p7 = scmp.ne.s32.totalorder %s394_s2, %s318_s10  ;;  %p322_p8 = scmp.lt.u32.totalorder %s318_s10, %s394_s2 }
 0x127   :  { %p324_p9 = pnand %p322_p8, %p319_p7 }
 0x129   :  { %327 = shalt.err (!%p324_p9)
}
 0x12a   :  { %s339_s15 = smov 64   ;;  %s340_s16 = smov 4  }
 0x12b   :  { %178 = dma.vmem_to_hbm [thread:$0]  %s173_s6, 128, %s394_s2, [#allocation4], %s339_s15, %s339_s15, %s340_s16  }
 0x12c   :  { %332 = dma.done.wait [#allocation4], 128  }
 0x12d   :  { %333 = vsyncadd [#allocation4], 4294967168 }
 0x12e   :  { %182 = vsyncpa [#allocation3], 1 }
 0x12f   :  { %183 = vsyncpa [#allocation6], 1 }
 0x130   :  { %184 = vsyncpa [#allocation4], 1 }

</bundles_post_ra>
